<compile_context>
chip_gen: v5e
topology: v5e:2x2
jax: 0.10.0
libtpu: 0.0.40
codegen_flags: <defaults>
</compile_context>

<pallas_src>
import jax
import jax.numpy as jnp
from jax.experimental import pallas as pl
from jax.experimental.pallas import tpu as pltpu

IN_FEATURES = 30
OUT_FEATURES = 42


def _round_up(x, m):
    return ((x + m - 1) // m) * m


def mlp_kernel(x_ref, w1_ref, b1_ref, w2_ref, b2_ref, o_ref):
    # x_ref : (TB, 30)  f32   natural row-major tile straight from HBM
    # w1_ref: (30, H)   bf16  (in, out) layout -> no transpose anywhere
    # b1_ref: (1, H)    f32
    # w2_ref: (H, 42)   bf16
    # b2_ref: (1, 42)   f32
    # o_ref : (TB, 42)  f32
    x = x_ref[...].astype(jnp.bfloat16)                     # cast fused in-kernel (VPU)
    h = jnp.dot(x, w1_ref[...], preferred_element_type=jnp.float32) + b1_ref[...]
    h = jnp.where(h > 0, h, 0.1 * h)                        # LeakyReLU(0.1), f32 on VPU
    y = jnp.dot(h.astype(jnp.bfloat16), w2_ref[...],
                preferred_element_type=jnp.float32) + b2_ref[...]
    o_ref[...] = jnp.maximum(y, 0.0)                        # ReLU


def network_forward(x, params, *, tile_b=8192):
    """Forward pass of `Network`. x: (..., 30) float32 -> (N, 42) float32."""
    w1, b1, w2, b2 = params
    H = w1.shape[1]

    x = x.reshape(-1, IN_FEATURES)          # torch view(-1, .) semantics for any batch rank
    B = x.shape[0]

    if B <= tile_b:
        tb = B                              # single block == full batch dim
        num_tiles = 1
    else:
        # Balanced tile sizes (even work per TensorCore on v7x), multiple of 128
        # sublanes; the partial last tile is handled by Pallas' masked boundary
        # DMA so no jnp.pad / extra HBM pass is needed.
        num_tiles = pl.cdiv(B, tile_b)
        tb = _round_up(pl.cdiv(B, num_tiles), 128)
        num_tiles = pl.cdiv(B, tb)

    out = pl.pallas_call(
        mlp_kernel,
        out_shape=jax.ShapeDtypeStruct((B, OUT_FEATURES), jnp.float32),
        grid=(num_tiles,),
        in_specs=[
            pl.BlockSpec((tb, IN_FEATURES), lambda i: (i, 0)),   # x tile: pipelined
            pl.BlockSpec((IN_FEATURES, H), lambda i: (0, 0)),    # weights: VMEM-resident
            pl.BlockSpec((1, H), lambda i: (0, 0)),
            pl.BlockSpec((H, OUT_FEATURES), lambda i: (0, 0)),
            pl.BlockSpec((1, OUT_FEATURES), lambda i: (0, 0)),
        ],
        out_specs=pl.BlockSpec((tb, OUT_FEATURES), lambda i: (i, 0)),
        compiler_params=pltpu.CompilerParams(
            dimension_semantics=("parallel",),   # shard batch tiles across TCs (v7x)
            vmem_limit_bytes=32 * 1024 * 1024,   # big tiles also fit on v5e (default 16 MiB)
        ),
    )(x, w1, b1, w2, b2)
    return out


def init_params(key, num_unit1):
    """nn.Linear-style U(-1/sqrt(fan_in), 1/sqrt(fan_in)) init, stored (in, out)."""
    k1, k2, k3, k4 = jax.random.split(key, 4)
    bound1 = IN_FEATURES ** -0.5
    bound2 = num_unit1 ** -0.5
    w1 = jax.random.uniform(k1, (IN_FEATURES, num_unit1), jnp.float32, -bound1, bound1)
    b1 = jax.random.uniform(k2, (1, num_unit1), jnp.float32, -bound1, bound1)
    w2 = jax.random.uniform(k3, (num_unit1, OUT_FEATURES), jnp.float32, -bound2, bound2)
    b2 = jax.random.uniform(k4, (1, OUT_FEATURES), jnp.float32, -bound2, bound2)
    # bf16 for the MXU operands (mem-bound kernel, deliberate quantization);
    # biases / accumulators / output stay f32.
    return w1.astype(jnp.bfloat16), b1, w2.astype(jnp.bfloat16), b2


def reference_forward(x, params):
    """Pure-JAX reference using the same bf16 quantization as the kernel."""
    w1, b1, w2, b2 = params
    x = x.reshape(-1, IN_FEATURES)
    h = jnp.dot(x.astype(jnp.bfloat16), w1, preferred_element_type=jnp.float32) + b1
    h = jnp.where(h > 0, h, 0.1 * h)
    y = jnp.dot(h.astype(jnp.bfloat16), w2, preferred_element_type=jnp.float32) + b2
    return jnp.maximum(y, 0.0)


if __name__ == "__main__":
    key = jax.random.PRNGKey(0)
    k_x1, k_x2, k_x3, k_p = jax.random.split(key, 4)

    num_unit1 = 32          # HPO hidden width (small, deterministic choice)
    params = init_params(k_p, num_unit1)

    # Small 2-D batch: single-block path (tb == B).
    x_small = jax.random.normal(k_x1, (8, IN_FEATURES), jnp.float32)
    out_small = jax.block_until_ready(network_forward(x_small, params))
    assert out_small.shape == (8, OUT_FEATURES)
    assert jnp.allclose(out_small, reference_forward(x_small, params), atol=1e-3, rtol=1e-3)

    # Higher-rank batch: exercises the view(-1, 42) semantics.
    x_rank3 = jax.random.normal(k_x2, (2, 4, IN_FEATURES), jnp.float32)
    out_rank3 = jax.block_until_ready(network_forward(x_rank3, params))
    assert out_rank3.shape == (8, OUT_FEATURES)
    assert jnp.allclose(out_rank3, reference_forward(x_rank3, params), atol=1e-3, rtol=1e-3)

    # Tiled path with a masked partial last tile: 300 rows, tb=128 -> 3 tiles.
    x_big = jax.random.normal(k_x3, (300, IN_FEATURES), jnp.float32)
    out_big = jax.block_until_ready(network_forward(x_big, params, tile_b=128))
    assert out_big.shape == (300, OUT_FEATURES)
    assert jnp.allclose(out_big, reference_forward(x_big, params), atol=1e-3, rtol=1e-3)

    print("KERNEL_OK")
</pallas_src>

<mosaic_0001>
module attributes {stable_mosaic.version = 11 : i64} {
  func.func @mlp_kernel(%arg0: i32, %arg1: memref<8x30xf32, #tpu.memory_space<vmem>>, %arg2: memref<30x32xbf16, #tpu.memory_space<vmem>>, %arg3: memref<1x32xf32, #tpu.memory_space<vmem>>, %arg4: memref<32x42xbf16, #tpu.memory_space<vmem>>, %arg5: memref<1x42xf32, #tpu.memory_space<vmem>>, %arg6: memref<8x42xf32, #tpu.memory_space<vmem>>) attributes {dimension_semantics = [#tpu.dimension_semantics<parallel>], iteration_bounds = array<i64: 1>, scalar_prefetch = 0 : i64, scratch_operands = 0 : i64, tpu.core_type = #tpu.core_type<tc>, window_params = [{transform_indices = @transform_0, window_bounds = array<i64: 8, 30>}, {pipeline_mode = #tpu.pipeline_mode<synchronous>, transform_indices = @transform_1, window_bounds = array<i64: 30, 32>}, {pipeline_mode = #tpu.pipeline_mode<synchronous>, transform_indices = @transform_2, window_bounds = array<i64: 1, 32>}, {pipeline_mode = #tpu.pipeline_mode<synchronous>, transform_indices = @transform_3, window_bounds = array<i64: 32, 42>}, {pipeline_mode = #tpu.pipeline_mode<synchronous>, transform_indices = @transform_4, window_bounds = array<i64: 1, 42>}, {transform_indices = @transform_5, window_bounds = array<i64: 8, 42>}]} {
    %c0 = arith.constant 0 : index
    %c0_0 = arith.constant 0 : index
    %0 = vector.load %arg1[%c0, %c0_0] : memref<8x30xf32, #tpu.memory_space<vmem>>, vector<8x30xf32>
    %1 = arith.truncf %0 : vector<8x30xf32> to vector<8x30xbf16>
    %c0_1 = arith.constant 0 : index
    %c0_2 = arith.constant 0 : index
    %2 = vector.load %arg2[%c0_1, %c0_2] : memref<30x32xbf16, #tpu.memory_space<vmem>>, vector<30x32xbf16>
    %cst = arith.constant dense<0.000000e+00> : vector<8x32xf32>
    %3 = tpu.matmul %1, %2, %cst {dimension_numbers = #tpu.dot_dimension_numbers<[1], [0], [0], [1], [0, 0, 1, 1], [], []>} : vector<8x30xbf16>, vector<30x32xbf16>, vector<8x32xf32> -> vector<8x32xf32>
    %c0_3 = arith.constant 0 : index
    %c0_4 = arith.constant 0 : index
    %4 = vector.load %arg3[%c0_3, %c0_4] : memref<1x32xf32, #tpu.memory_space<vmem>>, vector<1x32xf32>
    %5 = vector.broadcast %4 : vector<1x32xf32> to vector<8x32xf32>
    %6 = arith.addf %3, %5 : vector<8x32xf32>
    %cst_5 = arith.constant 0.000000e+00 : f32
    %7 = vector.broadcast %cst_5 : f32 to vector<8x32xf32>
    %8 = arith.cmpf ogt, %6, %7 : vector<8x32xf32>
    %cst_6 = arith.constant 1.000000e-01 : f32
    %9 = vector.broadcast %cst_6 : f32 to vector<8x32xf32>
    %10 = arith.mulf %9, %6 : vector<8x32xf32>
    %11 = arith.select %8, %6, %10 : vector<8x32xi1>, vector<8x32xf32>
    %12 = arith.truncf %11 : vector<8x32xf32> to vector<8x32xbf16>
    %c0_7 = arith.constant 0 : index
    %c0_8 = arith.constant 0 : index
    %13 = vector.load %arg4[%c0_7, %c0_8] : memref<32x42xbf16, #tpu.memory_space<vmem>>, vector<32x42xbf16>
    %cst_9 = arith.constant dense<0.000000e+00> : vector<8x42xf32>
    %14 = tpu.matmul %12, %13, %cst_9 {dimension_numbers = #tpu.dot_dimension_numbers<[1], [0], [0], [1], [0, 0, 1, 1], [], []>} : vector<8x32xbf16>, vector<32x42xbf16>, vector<8x42xf32> -> vector<8x42xf32>
    %c0_10 = arith.constant 0 : index
    %c0_11 = arith.constant 0 : index
    %15 = vector.load %arg5[%c0_10, %c0_11] : memref<1x42xf32, #tpu.memory_space<vmem>>, vector<1x42xf32>
    %16 = vector.broadcast %15 : vector<1x42xf32> to vector<8x42xf32>
    %17 = arith.addf %14, %16 : vector<8x42xf32>
    %cst_12 = arith.constant 0.000000e+00 : f32
    %18 = vector.broadcast %cst_12 : f32 to vector<8x42xf32>
    %19 = arith.maximumf %17, %18 : vector<8x42xf32>
    %c0_13 = arith.constant 0 : index
    %c0_14 = arith.constant 0 : index
    %20 = vector.load %arg6[%c0_13, %c0_14] : memref<8x42xf32, #tpu.memory_space<vmem>>, vector<8x42xf32>
    tpu.vector_store %arg6[%c0_13, %c0_14], %19 {strides = array<i32>} : memref<8x42xf32, #tpu.memory_space<vmem>>, vector<8x42xf32>,
    return
  }
  func.func @transform_0(%arg0: i32) -> (i32, i32) {
    %c0_i32 = arith.constant 0 : i32
    %c0_i32_0 = arith.constant 0 : i32
    return %arg0, %c0_i32 : i32, i32
  }
  func.func @transform_1(%arg0: i32) -> (i32, i32) {
    %c0_i32 = arith.constant 0 : i32
    %c0_i32_0 = arith.constant 0 : i32
    %c0_i32_1 = arith.constant 0 : i32
    return %c0_i32, %c0_i32_0 : i32, i32
  }
  func.func @transform_2(%arg0: i32) -> (i32, i32) {
    %c0_i32 = arith.constant 0 : i32
    %c0_i32_0 = arith.constant 0 : i32
    %c0_i32_1 = arith.constant 0 : i32
    return %c0_i32, %c0_i32_0 : i32, i32
  }
  func.func @transform_3(%arg0: i32) -> (i32, i32) {
    %c0_i32 = arith.constant 0 : i32
    %c0_i32_0 = arith.constant 0 : i32
    %c0_i32_1 = arith.constant 0 : i32
    return %c0_i32, %c0_i32_0 : i32, i32
  }
  func.func @transform_4(%arg0: i32) -> (i32, i32) {
    %c0_i32 = arith.constant 0 : i32
    %c0_i32_0 = arith.constant 0 : i32
    %c0_i32_1 = arith.constant 0 : i32
    return %c0_i32, %c0_i32_0 : i32, i32
  }
  func.func @transform_5(%arg0: i32) -> (i32, i32) {
    %c0_i32 = arith.constant 0 : i32
    %c0_i32_0 = arith.constant 0 : i32
    return %arg0, %c0_i32 : i32, i32
  }
}

</mosaic_0001>

<bundles_post_ra>
// kernel: tpu_custom_call.1
= control target key start
LH: loop header
LB: loop body
LE: loop exit
PB: predicated region body
PF: predicated region fallthrough
CT: control target
= control target key end

     0   :  { %10 = vsyncpa [#allocation3], 0  ;;  %s357_s0 = inlined_call_operand.hbm [shape: f32[8,30], index: 0, kind: input, shape index: {}]   ;;  %s358_s1 = inlined_call_operand.hbm [shape: bf16[30,32], index: 1, kind: input, shape index: {}]   ;;  %s359_s2 = inlined_call_operand.vmem [shape: f32[1,32], index: 2, kind: input, shape index: {}]   ;;  %s360_s3 = inlined_call_operand.hbm [shape: bf16[32,42], index: 3, kind: input, shape index: {}]   ;;  %s361_s4 = inlined_call_operand.vmem [shape: f32[1,42], index: 4, kind: input, shape index: {}]   ;;  %s362_s5 = inlined_call_operand.hbm [shape: f32[8,42], index: 5, kind: output, shape index: {}]  }
   0x1   :  { %11 = vsyncpa [#allocation6], 0  ;;  %s28_s20 = sshll.u32 %s358_s1, 4  ;;  %s29_s20 = int_to_ptr.hbm [resolvable:$true] %s28_s20 }
   0x2   :  { %12 = vsyncpa [#allocation4], 0  ;;  %s303_s21 = smov [#allocation5]   ;;  %s18_s25 = sshll.u32 %s357_s0, 4  ;;  %s19_s25 = int_to_ptr.hbm [resolvable:$true] %s18_s25 }
   0x3   :  { %s30_s22 = sshll.u32 %s303_s21, 4  ;;  %s304_s26 = smov 64   ;;  %s31_s22 = int_to_ptr.vmem [resolvable:$true] %s30_s22 }
   0x4   :  { %s305_s27 = smov 4   ;;  %s306_s28 = smov [#allocation2]  }
   0x5   :  { %36 = dma.hbm_to_vmem [thread:$0]  %s29_s20, 256, %s31_s22, [#allocation6], %s304_s26, %s304_s26, %s305_s27  }
   0x6   :  { %s20_s29 = sshll.u32 %s306_s28, 4  ;;  %s43_s7 = sshll.u32 %s360_s3, 4  ;;  %s21_s29 = int_to_ptr.vmem [resolvable:$true] %s20_s29  ;;  %s44_s7 = int_to_ptr.hbm [resolvable:$true] %s43_s7 }
   0x7   :  { %23 = dma.hbm_to_vmem [thread:$0]  %s19_s25, 128, %s21_s29, [#allocation3]  }
   0x8   :  { %s307_s1 = smov [#allocation7]  }
   0x9   :  { %s45_s8 = sshll.u32 %s307_s1, 4  ;;  %s46_s8 = int_to_ptr.vmem [resolvable:$true] %s45_s8 }
   0xa   :  { %51 = dma.hbm_to_vmem [thread:$0]  %s44_s7, 256, %s46_s8, [#allocation6], %s304_s26, %s304_s26, %s305_s27  }
   0xb   :  { %297 = dma.done.wait [#allocation3], 128  }
   0xc   :  { %298 = vsyncadd [#allocation3], 4294967168 }
   0xd   :  { %299 = dma.done.wait [#allocation6], 512  }
   0xe   :  { %300 = vsyncadd [#allocation6], 4294966784  ;;  %v177_v0 = vld [vmem:[#allocation5 + $0x8] sm:$0xf]  ;;  %v190_v1 = vld [vmem:[#allocation5 + $0x8] sm:$0x70] }
   0xf   :  { %vm92_vm0 = vcmask 1046528   ;;  %v178_v2 = vor.u32 %v190_v1, %v177_v0  ;;  %v189_v4 = vld [vmem:[#allocation5] sm:$0xff]  ;;  %v67_v5 = vld [vmem:[#allocation2] sm:$0xff]  ;;  %vm88_vm1 = vcmask 244736   ;;  %v191_v8 = vld [vmem:[#allocation7] sm:$0xff]  ;;  %vm133_vm3 = vcmask 261120  }
  0x10   :  { %v68_v6 = vpack.c.bf16 %v67_v5, %v67_v5  ;;  %v192_v7 = vld [vmem:[#allocation7 + $0x8] sm:$0xff]  ;;  %s308_s11 = smov [#allocation8]   ;;  %vm151_vm4 = vcmask 343040  }
  0x11   :  { %v94_v3 = vsel %vm92_vm0, %v178_v2, 0  ;;  %143 = vmatpush.bf16.msra.mxu1 %v192_v7  ;;  %v199_v9 = vld [vmem:[%s359_s2] ss:$0 sm:$0xff]  ;;  %s158_s12 = sshll.u32 %s308_s11, 4  ;;  %s160_s2 = sshll.u32 %s362_s5, 4  ;;  %s159_s12 = int_to_ptr.vmem [resolvable:$true] %s158_s12  ;;  %s161_s2 = int_to_ptr.hbm [resolvable:$true] %s160_s2 }
  0x12   :  { %102 = vmatpush.bf16.msra.mxu0 %v94_v3  ;;  %v200_v16 = vld [vmem:[%s361_s4] ss:$0 sm:$0xff] }
  0x15   :  { %144 = vmatpush.bf16.msra.mxu1 %v191_v8 }
  0x16   :  { %103 = vmatpush.bf16.msra.mxu0 %v189_v4 }
  0x19   :  { %179 = vmatmul.msk.bf16.vlgmr.msra.gmra.mxu0 %vm88_vm1, %v68_v6 }
  0x96   :  { %v105_v10 = vpop.f32.mrf.mxu0 }
  0x97   :  { %v106_v11 = vadd.f32 %v199_v9, %v105_v10 }
  0x99   :  { %vm109_vm2 = vcmp.gt.f32.partialorder %v106_v11, 0.0  ;;  %v110_v12 = vmul.f32 0.1, %v106_v11 }
  0x9b   :  { %v111_v13 = vsel %vm109_vm2, %v106_v11, %v110_v12 }
  0x9c   :  { %v112_v14 = vpack.c.bf16 %v111_v13, %v111_v13 }
  0x9e   :  { %v107_v15 = vpop.f32.mrf.mxu0  ;;  %188 = vmatmul.msk.bf16.vlgmr.msra.gmra.mxu1 %vm133_vm3, %v112_v14 }
 0x11b   :  { %v146_v17 = vpop.f32.mrf.mxu1 }
 0x11c   :  { %v147_v18 = vadd.f32 %v200_v16, %v146_v17 }
 0x11e   :  { %v150_v19 = vmax.f32 %v147_v18, 0.0 }
 0x120   :  { %152 = vst.msk [vmem:[#allocation8] sm:$0xff] %vm151_vm4, %v150_v19 }
 0x121   :  { %163 = dma.vmem_to_hbm [thread:$0]  %s159_s12, 128, %s161_s2, [#allocation4]  }
 0x123   :  { %v148_v20 = vpop.f32.mrf.mxu1 }
 0x124   :  { %301 = dma.done.wait [#allocation4], 128  }
 0x125   :  { %302 = vsyncadd [#allocation4], 4294967168 }
 0x126   :  { %168 = vsyncpa [#allocation3], 1 }
 0x127   :  { %169 = vsyncpa [#allocation6], 1 }
 0x128   :  { %170 = vsyncpa [#allocation4], 1 }

</bundles_post_ra>
